<compile_context>
chip_gen: v5e
topology: v5e:2x2
jax: 0.10.0
libtpu: 0.0.40
codegen_flags: <defaults>
</compile_context>

<pallas_src>
import jax
import jax.numpy as jnp
from jax.experimental import pallas as pl
from jax.experimental.pallas import tpu as pltpu

ORDER = 2
DATA_DIM = 16
C = ORDER * DATA_DIM       # total feature dim of x (32)
H = 32                     # hidden width of the wrapped MLP
B = 256                    # demo batch size

MAX_TILE_B = 2048          # cap per-step batch tile; keeps VMEM tiny even on v7x (64 MiB)


def _round_up(n, m):
    return ((n + m - 1) // m) * m


def _wrapper_kernel(xT_ref, w1T_ref, b1_ref, w2T_ref, b2_ref, oT_ref):
    # Feature-major: lane axis = batch -> lane-dense unmasked stores, MXU N-dim = TILE_B.
    xT = xT_ref[...]                                                     # [C, TB]
    hT = jnp.tanh(
        jnp.dot(w1T_ref[...], xT, preferred_element_type=jnp.float32) + b1_ref[...]
    )                                                                    # [H, TB]
    yT = jnp.dot(w2T_ref[...], hT, preferred_element_type=jnp.float32) + b2_ref[...]
    # concat(u[1:] + [net(x)], feature dim)  ==  sublane shift by DATA_DIM + append.
    # DATA_DIM=16 and C=32 are multiples of 8 -> tile-aligned, no lane shuffles needed.
    oT_ref[...] = jnp.concatenate([xT[DATA_DIM:, :], yT.astype(oT_ref.dtype)], axis=0)


@jax.jit
def neural_net_wrapper_forward(t, x, w1, b1, w2, b2):
    # `t` is unused by the module's forward (kept for API parity).
    del t
    b, c = x.shape

    # ---- wrapper-side layout plumbing: feature-major (transposed) operands ----
    xT = x.T                              # [C, B]
    w1T = w1.T                            # [H, C]
    w2T = w2.T                            # [DATA_DIM, H]
    b1c = jnp.reshape(b1, (H, 1))         # lane-broadcast biases
    b2c = jnp.reshape(b2, (DATA_DIM, 1))

    # ---- batch tiling: one big block for small B, capped lane-aligned tiles at scale ----
    bp = _round_up(b, 128)                # lane-dense store width
    tile_b = min(bp, MAX_TILE_B)
    bp = _round_up(bp, tile_b)
    if bp != b:
        xT = jnp.pad(xT, ((0, 0), (0, bp - b)))

    grid = (bp // tile_b,)

    outT = pl.pallas_call(
        _wrapper_kernel,
        out_shape=jax.ShapeDtypeStruct((c, bp), jnp.float32),
        grid_spec=pltpu.PrefetchScalarGridSpec(
            num_scalar_prefetch=0,
            grid=grid,
            in_specs=[
                # x^T: tiled along the batch (lane) axis.
                pl.BlockSpec((c, tile_b), lambda i: (0, i)),
                # weights / biases: constant index_map -> fetched once, VMEM-resident.
                pl.BlockSpec((H, c), lambda i: (0, 0)),
                pl.BlockSpec((H, 1), lambda i: (0, 0)),
                pl.BlockSpec((DATA_DIM, H), lambda i: (0, 0)),
                pl.BlockSpec((DATA_DIM, 1), lambda i: (0, 0)),
            ],
            out_specs=pl.BlockSpec((c, tile_b), lambda i: (0, i)),
        ),
        # out^T has the same shape/dtype as (padded) x^T and each block is fully read
        # into VMEM before its writeback -> safe to reuse the HBM buffer.
        input_output_aliases={0: 0},
        compiler_params=pltpu.CompilerParams(
            dimension_semantics=("parallel",),
        ),
    )(xT, w1T, b1c, w2T, b2c)

    return outT[:, :b].T


def _reference(x, w1, b1, w2, b2):
    y = jnp.tanh(x @ w1 + b1) @ w2 + b2
    return jnp.concatenate([x[:, DATA_DIM:], y], axis=1)


if __name__ == "__main__":
    key = jax.random.PRNGKey(0)
    kx, k1, k2, k3, k4 = jax.random.split(key, 5)

    x = jax.random.normal(kx, (B, C), dtype=jnp.float32)
    t = jnp.zeros((B, 1), dtype=jnp.float32)  # unused by forward, mirrors the torch API

    # Deterministic params for the wrapped net (Linear(C,H) -> tanh -> Linear(H,DATA_DIM))
    w1 = jax.random.normal(k1, (C, H), dtype=jnp.float32) * 0.1
    b1 = jax.random.normal(k2, (1, H), dtype=jnp.float32) * 0.1
    w2 = jax.random.normal(k3, (H, DATA_DIM), dtype=jnp.float32) * 0.1
    b2 = jax.random.normal(k4, (1, DATA_DIM), dtype=jnp.float32) * 0.1

    out = neural_net_wrapper_forward(t, x, w1, b1, w2, b2)
    out = jax.block_until_ready(out)

    ref = _reference(x, w1, b1, w2, b2)
    assert out.shape == (B, C)
    assert jnp.allclose(out, ref, atol=1e-5, rtol=1e-5)

    print("KERNEL_OK")
</pallas_src>

<mosaic_0001>
module attributes {stable_mosaic.version = 11 : i64} {
  func.func @_wrapper_kernel(%arg0: i32, %arg1: memref<32x256xf32, #tpu.memory_space<vmem>>, %arg2: memref<32x32xf32, #tpu.memory_space<vmem>>, %arg3: memref<32x1xf32, #tpu.memory_space<vmem>>, %arg4: memref<16x32xf32, #tpu.memory_space<vmem>>, %arg5: memref<16x1xf32, #tpu.memory_space<vmem>>, %arg6: memref<32x256xf32, #tpu.memory_space<vmem>>) attributes {dimension_semantics = [#tpu.dimension_semantics<parallel>], iteration_bounds = array<i64: 1>, scalar_prefetch = 0 : i64, scratch_operands = 0 : i64, tpu.core_type = #tpu.core_type<tc>, window_params = [{transform_indices = @transform_0, window_bounds = array<i64: 32, 256>}, {pipeline_mode = #tpu.pipeline_mode<synchronous>, transform_indices = @transform_1, window_bounds = array<i64: 32, 32>}, {pipeline_mode = #tpu.pipeline_mode<synchronous>, transform_indices = @transform_2, window_bounds = array<i64: 32, 1>}, {pipeline_mode = #tpu.pipeline_mode<synchronous>, transform_indices = @transform_3, window_bounds = array<i64: 16, 32>}, {pipeline_mode = #tpu.pipeline_mode<synchronous>, transform_indices = @transform_4, window_bounds = array<i64: 16, 1>}, {transform_indices = @transform_5, window_bounds = array<i64: 32, 256>}]} {
    %c0 = arith.constant 0 : index
    %c0_0 = arith.constant 0 : index
    %0 = vector.load %arg1[%c0, %c0_0] : memref<32x256xf32, #tpu.memory_space<vmem>>, vector<32x256xf32>
    %c0_1 = arith.constant 0 : index
    %c0_2 = arith.constant 0 : index
    %1 = vector.load %arg2[%c0_1, %c0_2] : memref<32x32xf32, #tpu.memory_space<vmem>>, vector<32x32xf32>
    %cst = arith.constant dense<0.000000e+00> : vector<32x256xf32>
    %2 = tpu.matmul %1, %0, %cst {dimension_numbers = #tpu.dot_dimension_numbers<[1], [0], [0], [1], [0, 0, 1, 1], [], []>} : vector<32x32xf32>, vector<32x256xf32>, vector<32x256xf32> -> vector<32x256xf32>
    %c0_3 = arith.constant 0 : index
    %c0_4 = arith.constant 0 : index
    %3 = vector.load %arg3[%c0_3, %c0_4] : memref<32x1xf32, #tpu.memory_space<vmem>>, vector<32x1xf32>
    %4 = vector.broadcast %3 : vector<32x1xf32> to vector<32x256xf32>
    %5 = arith.addf %2, %4 : vector<32x256xf32>
    %6 = math.tanh %5 : vector<32x256xf32>
    %c0_5 = arith.constant 0 : index
    %c0_6 = arith.constant 0 : index
    %7 = vector.load %arg4[%c0_5, %c0_6] : memref<16x32xf32, #tpu.memory_space<vmem>>, vector<16x32xf32>
    %cst_7 = arith.constant dense<0.000000e+00> : vector<16x256xf32>
    %8 = tpu.matmul %7, %6, %cst_7 {dimension_numbers = #tpu.dot_dimension_numbers<[1], [0], [0], [1], [0, 0, 1, 1], [], []>} : vector<16x32xf32>, vector<32x256xf32>, vector<16x256xf32> -> vector<16x256xf32>
    %c0_8 = arith.constant 0 : index
    %c0_9 = arith.constant 0 : index
    %9 = vector.load %arg5[%c0_8, %c0_9] : memref<16x1xf32, #tpu.memory_space<vmem>>, vector<16x1xf32>
    %10 = vector.broadcast %9 : vector<16x1xf32> to vector<16x256xf32>
    %11 = arith.addf %8, %10 : vector<16x256xf32>
    %12 = vector.extract_strided_slice %0 {offsets = [16, 0], sizes = [16, 256], strides = [1, 1]} : vector<32x256xf32> to vector<16x256xf32>
    %13 = tpu.concatenate %12, %11 in 0 : vector<16x256xf32>, vector<16x256xf32> -> vector<32x256xf32>
    %c0_10 = arith.constant 0 : index
    %c0_11 = arith.constant 0 : index
    %14 = vector.load %arg6[%c0_10, %c0_11] : memref<32x256xf32, #tpu.memory_space<vmem>>, vector<32x256xf32>
    tpu.vector_store %arg6[%c0_10, %c0_11], %13 {strides = array<i32>} : memref<32x256xf32, #tpu.memory_space<vmem>>, vector<32x256xf32>,
    return
  }
  func.func @transform_0(%arg0: i32) -> (i32, i32) {
    %c0_i32 = arith.constant 0 : i32
    %c0_i32_0 = arith.constant 0 : i32
    return %c0_i32, %arg0 : i32, i32
  }
  func.func @transform_1(%arg0: i32) -> (i32, i32) {
    %c0_i32 = arith.constant 0 : i32
    %c0_i32_0 = arith.constant 0 : i32
    %c0_i32_1 = arith.constant 0 : i32
    return %c0_i32, %c0_i32_0 : i32, i32
  }
  func.func @transform_2(%arg0: i32) -> (i32, i32) {
    %c0_i32 = arith.constant 0 : i32
    %c0_i32_0 = arith.constant 0 : i32
    %c0_i32_1 = arith.constant 0 : i32
    return %c0_i32, %c0_i32_0 : i32, i32
  }
  func.func @transform_3(%arg0: i32) -> (i32, i32) {
    %c0_i32 = arith.constant 0 : i32
    %c0_i32_0 = arith.constant 0 : i32
    %c0_i32_1 = arith.constant 0 : i32
    return %c0_i32, %c0_i32_0 : i32, i32
  }
  func.func @transform_4(%arg0: i32) -> (i32, i32) {
    %c0_i32 = arith.constant 0 : i32
    %c0_i32_0 = arith.constant 0 : i32
    %c0_i32_1 = arith.constant 0 : i32
    return %c0_i32, %c0_i32_0 : i32, i32
  }
  func.func @transform_5(%arg0: i32) -> (i32, i32) {
    %c0_i32 = arith.constant 0 : i32
    %c0_i32_0 = arith.constant 0 : i32
    return %c0_i32, %arg0 : i32, i32
  }
}

</mosaic_0001>

<bundles_post_ra>
// kernel: neural_net_wrapper_forward.1
= control target key start
LH: loop header
LB: loop body
LE: loop exit
PB: predicated region body
PF: predicated region fallthrough
CT: control target
= control target key end

     0   :  { %v253_v3 = vmov 0   ;;  %vm56_vm0 = vcmask 261120   ;;  %s380_s0 = inlined_call_operand.vmem [shape: f32[32,256], index: 0, kind: input, shape index: {}, may-alias: {0,5}]   ;;  %s381_s5 = inlined_call_operand.vmem [shape: f32[32,256], index: 5, kind: output, shape index: {}, may-alias: {0,5}]   ;;  %s382_s1 = inlined_call_operand.vmem [shape: f32[32,32], index: 1, kind: input, shape index: {}]   ;;  %s383_s2 = inlined_call_operand.vmem [shape: f32[32,1], index: 2, kind: input, shape index: {}]   ;;  %s384_s4 = inlined_call_operand.vmem [shape: f32[16,1], index: 4, kind: input, shape index: {}]   ;;  %s385_s3 = inlined_call_operand.vmem [shape: f32[16,32], index: 3, kind: input, shape index: {}]  }
   0x1   :  { %v26_v0 = vld [vmem:[%s380_s0 + $0x30] sm:$0xff]  ;;  %v27_v1 = vld [vmem:[%s380_s0 + $0x38] sm:$0xff]  ;;  %v24_v2 = vld [vmem:[%s380_s0 + $0x20] sm:$0xff]  ;;  %235 = vset.pattern.permute.xlu1 %v253_v3  ;;  %234 = vset.pattern.permute.xlu0 %v253_v3 }
   0x2   :  { %81 = vmatpush.msra.mxu0 %v26_v0  ;;  %110 = vmatpush.msra.mxu1 %v27_v1  ;;  %v25_v4 = vld [vmem:[%s380_s0 + $0x28] sm:$0xff]  ;;  %v22_v5 = vld [vmem:[%s380_s0 + $0x10] sm:$0xff]  ;;  %v28_v9 = vld [vmem:[%s382_s1] sm:$0xff] }
   0x3   :  { %225 = vmatpush.msra.mxu2 %v26_v0  ;;  %229 = vmatpush.msra.mxu3 %v27_v1  ;;  %203 = vst [vmem:[%s381_s5 + $0x10] sm:$0xff] %v26_v0  ;;  %v31_v10 = vld [vmem:[%s382_s1 + $0x18] sm:$0xff]  ;;  %v33_v11 = vld [vmem:[%s383_s2 + $0x8] sm:$0xff]  ;;  %v32_v14 = vld [vmem:[%s383_s2] sm:$0xff] }
   0x4   :  { %82 = vmatpush.msra.mxu0 %v24_v2  ;;  %111 = vmatpush.msra.mxu1 %v25_v4  ;;  %v35_v12 = vld [vmem:[%s383_s2 + $0x18] sm:$0xff]  ;;  %v29_v13 = vld [vmem:[%s382_s1 + $0x8] sm:$0xff]  ;;  %v34_v15 = vld [vmem:[%s383_s2 + $0x10] sm:$0xff] }
   0x5   :  { %226 = vmatpush.msra.mxu2 %v24_v2  ;;  %230 = vmatpush.msra.mxu3 %v25_v4  ;;  %v30_v16 = vld [vmem:[%s382_s1 + $0x10] sm:$0xff]  ;;  %v137_v23 = vld [vmem:[%s384_s4] sm:$0xff]  ;;  %v138_v28 = vld [vmem:[%s384_s4 + $0x8] sm:$0xff] }
   0x6   :  { %83 = vmatpush.msra.mxu0 %v22_v5  ;;  %43 = vperm.xlu1 %235, %v33_v11   ;;  %v135_v45 = vld [vmem:[%s385_s3] sm:$0xff]  ;;  %v136_v48 = vld [vmem:[%s385_s3 + $0x8] sm:$0xff] }
   0x7   :  { %227 = vmatpush.msra.mxu2 %v22_v5  ;;  %53 = vperm.xlu0 %234, %v35_v12  }
   0x8   :  { %236 = vset.pattern.permute.xlu2 %v253_v3 }
   0x9   :  { %141 = vperm.xlu2 %236, %v137_v23  }
   0xa   :  { %v23_v6 = vld [vmem:[%s380_s0 + $0x18] sm:$0xff] }
   0xb   :  { %204 = vst [vmem:[%s381_s5 + $0x18] sm:$0xff] %v27_v1  ;;  %112 = vmatpush.msra.mxu1 %v23_v6  ;;  %231 = vmatpush.msra.mxu3 %v23_v6 }
   0xe   :  { %38 = vperm.xlu1 %235, %v32_v14  }
   0xf   :  { %48 = vperm.xlu0 %234, %v34_v15  }
  0x11   :  { %146 = vperm.xlu2 %236, %v138_v28  }
  0x12   :  { %v20_v7 = vld [vmem:[%s380_s0] sm:$0xff] }
  0x13   :  { %201 = vst [vmem:[%s381_s5] sm:$0xff] %v24_v2  ;;  %84 = vmatpush.msra.mxu0 %v20_v7  ;;  %228 = vmatpush.msra.mxu2 %v20_v7 }
  0x14   :  { %213 = vmatmul.msk.f32.vlgmr.msra.gmra.mxu0 %vm56_vm0, %v28_v9  ;;  %216 = vmatmul.msk.f32.vlgmr.msra.gmra.mxu2 %vm56_vm0, %v31_v10 }
  0x1a   :  { %v21_v8 = vld [vmem:[%s380_s0 + $0x8] sm:$0xff] }
  0x1b   :  { %202 = vst [vmem:[%s381_s5 + $0x8] sm:$0xff] %v25_v4  ;;  %113 = vmatpush.msra.mxu1 %v21_v8  ;;  %232 = vmatpush.msra.mxu3 %v21_v8 }
  0x1c   :  { %217 = vmatmul.msk.f32.vlgmr.msra.gmra.mxu1 %vm56_vm0, %v28_v9  ;;  %220 = vmatmul.msk.f32.vlgmr.msra.gmra.mxu3 %vm56_vm0, %v31_v10 }
  0x1d   :  { %214 = vmatmul.msk.f32.gmra.mxu0 %vm56_vm0, %v29_v13 }
  0x24   :  { %218 = vmatmul.msk.f32.gmra.mxu1 %vm56_vm0, %v29_v13 }
  0x25   :  { %215 = vmatmul.msk.f32.gmra.mxu0 %vm56_vm0, %v30_v16 }
  0x2c   :  { %219 = vmatmul.msk.f32.gmra.mxu1 %vm56_vm0, %v30_v16 }
  0x63   :  { %v142_v49 = vpop.permute.xlu2 %141 }
  0x6b   :  { %v147_v54 = vpop.permute.xlu2 %146 }
  0x78   :  { %v44_v19 = vpop.permute.xlu1 %43 }
  0x79   :  { %v54_v20 = vpop.permute.xlu0 %53 }
  0x80   :  { %v39_v29 = vpop.permute.xlu1 %38 }
  0x81   :  { %v49_v30 = vpop.permute.xlu0 %48 }
  0x91   :  { %v86_v17 = vpop.f32.mrf.mxu0 }
  0x92   :  { %v87_v38 = vadd.f32 %v86_v17, %v39_v29 }
  0x97   :  { %v95_v22 = vpop.f32.mrf.mxu2 }
  0x98   :  { %v96_v24 = vadd.f32 %v95_v22, %v54_v20 }
  0x99   :  { %v115_v18 = vpop.f32.mrf.mxu1 }
  0x9a   :  { %v89_v21 = vpop.f32.mrf.mxu0  ;;  %237 = vtanh.f32 %v96_v24  ;;  %v116_v40 = vadd.f32 %v115_v18, %v39_v29 }
  0x9b   :  { %v90_v32 = vadd.f32 %v89_v21, %v44_v19 }
  0x9f   :  { %v124_v26 = vpop.f32.mrf.mxu3 }
  0xa0   :  { %v125_v27 = vadd.f32 %v124_v26, %v54_v20  ;;  %v238_v35 = vpop.eup %237 }
  0xa1   :  { %v118_v25 = vpop.f32.mrf.mxu1  ;;  %167 = vmatpush.msrb.mxu2 %v238_v35 }
  0xa2   :  { %239 = vtanh.f32 %v125_v27  ;;  %v92_v31 = vpop.f32.mrf.mxu0  ;;  %v119_v36 = vadd.f32 %v118_v25, %v44_v19 }
  0xa3   :  { %v93_v33 = vadd.f32 %v92_v31, %v49_v30 }
  0xa5   :  { %241 = vtanh.f32 %v93_v33 }
  0xa8   :  { %v240_v39 = vpop.eup %239 }
  0xa9   :  { %v121_v34 = vpop.f32.mrf.mxu1  ;;  %190 = vmatpush.msrb.mxu3 %v240_v39 }
  0xaa   :  { %v122_v37 = vadd.f32 %v121_v34, %v49_v30 }
  0xab   :  { %v242_v41 = vpop.eup %241 }
  0xac   :  { %243 = vtanh.f32 %v122_v37  ;;  %168 = vmatpush.msrb.mxu2 %v242_v41 }
  0xad   :  { %245 = vtanh.f32 %v90_v32 }
  0xae   :  { %247 = vtanh.f32 %v119_v36 }
  0xaf   :  { %249 = vtanh.f32 %v87_v38 }
  0xb0   :  { %251 = vtanh.f32 %v116_v40 }
  0xb2   :  { %v244_v42 = vpop.eup %243 }
  0xb3   :  { %v246_v43 = vpop.eup %245  ;;  %191 = vmatpush.msrb.mxu3 %v244_v42 }
  0xb4   :  { %v248_v44 = vpop.eup %247  ;;  %169 = vmatpush.msrb.mxu2 %v246_v43 }
  0xb5   :  { %v250_v46 = vpop.eup %249  ;;  %192 = vmatpush.msrb.mxu3 %v248_v44 }
  0xb6   :  { %v252_v47 = vpop.eup %251  ;;  %170 = vmatpush.msrb.mxu2 %v250_v46 }
  0xb7   :  { %193 = vmatpush.msrb.mxu3 %v252_v47  ;;  %221 = vmatmul.msk.f32.vlgmr.msrb.gmra.mxu2 %vm56_vm0, %v135_v45 }
  0xb8   :  { %223 = vmatmul.msk.f32.vlgmr.msrb.gmra.mxu3 %vm56_vm0, %v135_v45 }
  0xbf   :  { %222 = vmatmul.msk.f32.gmra.mxu2 %vm56_vm0, %v136_v48 }
  0xc0   :  { %224 = vmatmul.msk.f32.gmra.mxu3 %vm56_vm0, %v136_v48 }
 0x13a   :  { %v172_v50 = vpop.f32.mrf.mxu2 }
 0x13b   :  { %v173_v51 = vadd.f32 %v172_v50, %v142_v49  ;;  %v195_v52 = vpop.f32.mrf.mxu3 }
 0x13c   :  { %v196_v53 = vadd.f32 %v195_v52, %v142_v49 }
 0x13d   :  { %205 = vst [vmem:[%s381_s5 + $0x20] sm:$0xff] %v173_v51 }
 0x13e   :  { %206 = vst [vmem:[%s381_s5 + $0x28] sm:$0xff] %v196_v53 }
 0x142   :  { %v175_v55 = vpop.f32.mrf.mxu2 }
 0x143   :  { %v176_v56 = vadd.f32 %v175_v55, %v147_v54  ;;  %v198_v57 = vpop.f32.mrf.mxu3 }
 0x144   :  { %v199_v58 = vadd.f32 %v198_v57, %v147_v54 }
 0x145   :  { %207 = vst [vmem:[%s381_s5 + $0x30] sm:$0xff] %v176_v56 }
 0x146   :  { %208 = vst [vmem:[%s381_s5 + $0x38] sm:$0xff] %v199_v58 }

</bundles_post_ra>
